<compile_context>
chip_gen: v5e
topology: v5e:2x2
jax: 0.10.0
libtpu: 0.0.40
codegen_flags: <defaults>
</compile_context>

<pallas_src>
import functools
import math

import jax
import jax.numpy as jnp
from jax.experimental import pallas as pl
from jax.experimental.pallas import tpu as pltpu


def _leaky_relu(x, slope=0.01):
    return jnp.where(x > 0, x, slope * x)


def pinsage_fused_kernel(n_max, T, in_f, hid_f, out_f, num_nodes,
                         # scalar prefetch (SMEM)
                         nvalid_ref,
                         # inputs
                         h_hbm_ref,        # ANY/HBM: (num_nodes, in_f)
                         ns_col_ref,       # VMEM (n_max, 1)  int32 nodeset
                         ns_row_ref,       # VMEM (1, n_max)  int32 nodeset
                         nb_ref,           # VMEM (n_max, T)  int32 neighbor ids
                         w_ref,            # VMEM (n_max, T)  f32 neighbor weights
                         invden_ref,       # VMEM (n_max, 1)  f32 1/sum(w) (guarded)
                         qw_ref, qb_ref,           # (in_f, hid_f), (1, hid_f)
                         wself_ref, wagg_ref, wb_ref,  # (in_f,out_f),(hid_f,out_f),(1,out_f)
                         # output
                         out_ref,          # (n_max, out_f)
                         # scratch (persists across the layer grid)
                         h_scr,            # VMEM (num_nodes, in_f) resident table
                         dma_sem):
    """One grid step == one PinSageConv layer on the resident embedding table."""
    l = pl.program_id(0)
    last = pl.num_programs(0) - 1
    n_valid = nvalid_ref[l]

    # Layer 0: DMA the table HBM -> VMEM once; it stays resident for all layers.
    @pl.when(l == 0)
    def _():
        cp = pltpu.make_async_copy(h_hbm_ref, h_scr, dma_sem)
        cp.start()
        cp.wait()

    h = h_scr[...]                                        # (num_nodes, in_f)

    # ---- get_embeddings(h, nodeset): one-hot gather on the MXU -------------
    col = jax.lax.broadcasted_iota(jnp.int32, (n_max, num_nodes), 1)
    onehot_self = (col == ns_col_ref[...]).astype(jnp.float32)   # (n_max, num_nodes)
    hs = jnp.dot(onehot_self, h, preferred_element_type=jnp.float32)  # (n_max, in_f)

    # ---- q = leaky_relu(Q(h)) applied once to the resident table -----------
    # (per-row op, so identical to applying Q to the gathered neighbor rows)
    q_all = _leaky_relu(
        jnp.dot(h, qw_ref[...], preferred_element_type=jnp.float32)
        + qb_ref[...])                                    # (num_nodes, hid_f)

    # ---- weighted neighbor aggregation: weighted-one-hot gather matmul -----
    wgt = w_ref[...]                                      # (n_max, T)
    nb = nb_ref[...]                                      # (n_max, T)
    agg_mat = jnp.zeros((n_max, num_nodes), jnp.float32)
    for t in range(T):                                    # T small & static (VPU)
        agg_mat = agg_mat + jnp.where(col == nb[:, t:t + 1], wgt[:, t:t + 1], 0.0)
    h_agg = (jnp.dot(agg_mat, q_all, preferred_element_type=jnp.float32)
             * invden_ref[...])                           # safediv via host inv_den

    # ---- h_new = leaky_relu(hs @ W_self + h_agg @ W_agg + b) ---------------
    h_new = jnp.dot(hs, wself_ref[...], preferred_element_type=jnp.float32)
    h_new = h_new + jnp.dot(h_agg, wagg_ref[...],
                            preferred_element_type=jnp.float32)
    h_new = _leaky_relu(h_new + wb_ref[...])

    # ---- L2 row normalization with safediv (EUP rsqrt) ---------------------
    sq = jnp.sum(h_new * h_new, axis=-1, keepdims=True)
    inv_norm = jnp.where(sq == 0.0, 1.0, jax.lax.rsqrt(sq))
    new = h_new * inv_norm                                # (n_max, out_f)

    # ---- put_embeddings: one-hot scatter back into the resident table ------
    # (assumes unique nodeset ids, as produced by the random-walk nodeflow)
    rowj = jax.lax.broadcasted_iota(jnp.int32, (num_nodes, n_max), 0)
    coli = jax.lax.broadcasted_iota(jnp.int32, (num_nodes, n_max), 1)
    sc = jnp.where((rowj == ns_row_ref[...]) & (coli < n_valid), 1.0, 0.0)
    scattered = jnp.dot(sc, new, preferred_element_type=jnp.float32)
    hit = jnp.sum(sc, axis=-1, keepdims=True)             # (num_nodes, 1)
    h_scr[...] = jnp.where(hit > 0.0, scattered, h)

    # ---- final get_embeddings(h, nodeset): rows are exactly `new` ----------
    @pl.when(l == last)
    def _():
        out_ref[...] = new.astype(out_ref.dtype)


def _padded_bytes(shape, itemsize=4):
    """f32 VMEM footprint of a tensor padded to (8, 128) tiles."""
    shape = tuple(int(d) for d in shape)
    if len(shape) == 1:
        shape = (1,) + shape
    *lead, r, c = shape
    r = ((r + 7) // 8) * 8
    c = ((c + 127) // 128) * 128
    n = r * c
    for d in lead:
        n *= d
    return n * itemsize


def pinsage_forward(h, nodeflow, conv_params):
    """Fused multi-layer PinSage forward (mirrors PinSage.forward)."""
    n_layers = len(nodeflow)
    num_nodes, in_f = h.shape
    hid_f = conv_params[0][0].shape[1]
    out_f = conv_params[0][2].shape[1]
    T = nodeflow[0][2].shape[1]

    # put_embeddings forces in_f == out_f at every layer, so per-layer tensors
    # have identical shapes and can be stacked along a leading layer axis.
    n_max = max(int(ns.shape[0]) for ns, _, _ in nodeflow)
    n_max = max(8, ((n_max + 7) // 8) * 8)        # sublane-friendly padding

    ns_col = jnp.zeros((n_layers, n_max, 1), jnp.int32)
    ns_row = jnp.zeros((n_layers, 1, n_max), jnp.int32)
    nb_all = jnp.zeros((n_layers, n_max, T), jnp.int32)
    w_all = jnp.zeros((n_layers, n_max, T), jnp.float32)
    invden_all = jnp.ones((n_layers, n_max, 1), jnp.float32)
    n_valid = []
    for li, (ns, w, nb) in enumerate(nodeflow):
        n = int(ns.shape[0])
        n_valid.append(n)
        ns32 = ns.astype(jnp.int32)
        ns_col = ns_col.at[li, :n, 0].set(ns32)
        ns_row = ns_row.at[li, 0, :n].set(ns32)
        nb_all = nb_all.at[li, :n].set(nb.astype(jnp.int32))
        wf = w.astype(jnp.float32)
        w_all = w_all.at[li, :n].set(wf)
        den = wf.sum(axis=1, keepdims=True)
        invden_all = invden_all.at[li, :n].set(
            1.0 / jnp.where(den == 0.0, 1.0, den))
    n_valid = jnp.asarray(n_valid, jnp.int32)

    qw_all = jnp.stack([p[0] for p in conv_params])                  # (L, in, hid)
    qb_all = jnp.stack([p[1].reshape(1, -1) for p in conv_params])   # (L, 1, hid)
    wself_all = jnp.stack([p[2][:in_f] for p in conv_params])        # (L, in, out)
    wagg_all = jnp.stack([p[2][in_f:] for p in conv_params])         # (L, hid, out)
    wb_all = jnp.stack([p[3].reshape(1, -1) for p in conv_params])   # (L, 1, out)

    # Explicit VMEM budget: one resident table + double-buffered per-layer
    # inputs + the output block + headroom for in-kernel temporaries.
    # (num_nodes * in_f * 4 must stay well under 64 MiB on v7x, 128 MiB on v5e/v6e.)
    per_layer = sum(_padded_bytes(s) for s in [
        (n_max, 1), (1, n_max), (n_max, T), (n_max, T), (n_max, 1),
        (in_f, hid_f), (1, hid_f), (in_f, out_f), (hid_f, out_f), (1, out_f)])
    vmem_bytes = (_padded_bytes((num_nodes, in_f))
                  + 2 * per_layer
                  + _padded_bytes((n_max, out_f))
                  + (8 << 20))

    kernel = functools.partial(pinsage_fused_kernel,
                               n_max, T, in_f, hid_f, out_f, num_nodes)
    out_padded = pl.pallas_call(
        kernel,
        out_shape=jax.ShapeDtypeStruct((n_max, out_f), h.dtype),
        grid_spec=pltpu.PrefetchScalarGridSpec(
            num_scalar_prefetch=1,
            grid=(n_layers,),
            in_specs=[
                pl.BlockSpec(memory_space=pl.ANY),                         # h (HBM)
                pl.BlockSpec((None, n_max, 1), lambda l, *_: (l, 0, 0)),   # nodeset col
                pl.BlockSpec((None, 1, n_max), lambda l, *_: (l, 0, 0)),   # nodeset row
                pl.BlockSpec((None, n_max, T), lambda l, *_: (l, 0, 0)),   # nb ids
                pl.BlockSpec((None, n_max, T), lambda l, *_: (l, 0, 0)),   # nb weights
                pl.BlockSpec((None, n_max, 1), lambda l, *_: (l, 0, 0)),   # inv_den
                pl.BlockSpec((None, in_f, hid_f), lambda l, *_: (l, 0, 0)),
                pl.BlockSpec((None, 1, hid_f), lambda l, *_: (l, 0, 0)),
                pl.BlockSpec((None, in_f, out_f), lambda l, *_: (l, 0, 0)),
                pl.BlockSpec((None, hid_f, out_f), lambda l, *_: (l, 0, 0)),
                pl.BlockSpec((None, 1, out_f), lambda l, *_: (l, 0, 0)),
            ],
            out_specs=pl.BlockSpec((n_max, out_f), lambda l, *_: (0, 0)),
            scratch_shapes=[
                pltpu.VMEM((num_nodes, in_f), jnp.float32),   # resident table
                pltpu.SemaphoreType.DMA(()),                  # layer-0 table DMA
            ],
        ),
        compiler_params=pltpu.CompilerParams(
            dimension_semantics=("arbitrary",),
            vmem_limit_bytes=int(vmem_bytes)),
    )(n_valid, h, ns_col, ns_row, nb_all, w_all, invden_all,
      qw_all, qb_all, wself_all, wagg_all, wb_all)

    last_n = int(nodeflow[-1][0].shape[0])
    return out_padded[:last_n]


def pinsage_reference(h, nodeflow, conv_params):
    """Pure-JAX reference matching the PyTorch module."""
    def safediv(a, b):
        b = jnp.where(b == 0, jnp.ones_like(b), b)
        return a / b

    nodeset = None
    for (nodeset, nb_weights, nb_nodes), (qw, qb, ww, wb) in zip(
            nodeflow, conv_params):
        n, T = nb_nodes.shape
        hs = h[nodeset]
        hn = h[nb_nodes.reshape(-1)].reshape(n, T, -1)
        q = _leaky_relu(jnp.dot(hn, qw,
                                precision=jax.lax.Precision.HIGHEST) + qb)
        h_agg = safediv((nb_weights[:, :, None] * q).sum(1),
                        nb_weights.sum(1, keepdims=True))
        h_cat = jnp.concatenate([hs, h_agg], axis=1)
        h_new = _leaky_relu(jnp.dot(h_cat, ww,
                                    precision=jax.lax.Precision.HIGHEST) + wb)
        h_new = safediv(h_new, jnp.linalg.norm(h_new, axis=1, keepdims=True))
        h = h.at[nodeset].set(h_new)
    return h[nodeset]


def init_linear(key, fan_in, fan_out):
    """xavier_uniform_ with gain=calculate_gain('leaky_relu'), zero bias.
    Stored as (fan_in, fan_out) so the kernel computes x @ W."""
    gain = math.sqrt(2.0 / (1.0 + 0.01 ** 2))
    bound = gain * math.sqrt(6.0 / (fan_in + fan_out))
    w = jax.random.uniform(key, (fan_in, fan_out), jnp.float32, -bound, bound)
    b = jnp.zeros((fan_out,), jnp.float32)
    return w, b


if __name__ == "__main__":
    key = jax.random.PRNGKey(0)

    # Small shapes consistent with the module.  put_embeddings requires
    # out_features == in_features at every layer, so all feature sizes match.
    num_nodes = 64
    feature_sizes = (32, 32, 32)   # in / hidden / out
    T = 4                          # neighbors per node
    n_layers = len(feature_sizes) - 1
    seed_batch = 8

    k_h, key = jax.random.split(key)
    h0 = jax.random.normal(k_h, (num_nodes, feature_sizes[0]), jnp.float32)

    conv_params = []
    for i in range(n_layers):
        in_f, out_f = feature_sizes[i], feature_sizes[i + 1]
        hid_f = feature_sizes[i + 1]
        kq, kw, key = jax.random.split(key, 3)
        qw, qb = init_linear(kq, in_f, hid_f)
        ww, wb = init_linear(kw, in_f + hid_f, out_f)
        conv_params.append((qw, qb, ww, wb))

    # Synthetic deterministic nodeflow (layer-wise nodesets, neighbor weights,
    # neighbor ids).  Last layer's nodeset is the seed minibatch.
    k_seed, key = jax.random.split(key)
    seed_nodeset = jax.random.choice(k_seed, num_nodes, (seed_batch,),
                                     replace=False).astype(jnp.int32)
    nodeflow = []
    layer_sizes = [16, seed_batch]          # wider set first, then the seeds
    for li in range(n_layers):
        kn, knb, kw_, key = jax.random.split(key, 4)
        if li == n_layers - 1:
            nodeset = seed_nodeset
        else:
            nodeset = jax.random.choice(kn, num_nodes, (layer_sizes[li],),
                                        replace=False).astype(jnp.int32)
        n = nodeset.shape[0]
        nb_nodes = jax.random.randint(knb, (n, T), 0, num_nodes, jnp.int32)
        nb_weights = jax.random.uniform(kw_, (n, T), jnp.float32)
        nodeflow.append((nodeset, nb_weights, nb_nodes))

    out = pinsage_forward(h0, nodeflow, conv_params)
    out = jax.block_until_ready(out)

    ref = pinsage_reference(h0, nodeflow, conv_params)
    assert out.shape == (seed_batch, feature_sizes[-1])
    assert jnp.all(jnp.isfinite(out))
    assert jnp.allclose(out, ref, rtol=1e-2, atol=1e-2), \
        float(jnp.max(jnp.abs(out - ref)))
    print("KERNEL_OK")
</pallas_src>

<mosaic_0001>
module attributes {stable_mosaic.version = 11 : i64} {
  func.func @pinsage_fused_kernel(%arg0: i32, %arg1: memref<2xi32, #tpu.memory_space<smem>>, %arg2: memref<64x32xf32, #tpu.memory_space<any>>, %arg3: memref<1x16x1xi32, #tpu.memory_space<vmem>>, %arg4: memref<1x1x16xi32, #tpu.memory_space<vmem>>, %arg5: memref<1x16x4xi32, #tpu.memory_space<vmem>>, %arg6: memref<1x16x4xf32, #tpu.memory_space<vmem>>, %arg7: memref<1x16x1xf32, #tpu.memory_space<vmem>>, %arg8: memref<1x32x32xf32, #tpu.memory_space<vmem>>, %arg9: memref<1x1x32xf32, #tpu.memory_space<vmem>>, %arg10: memref<1x32x32xf32, #tpu.memory_space<vmem>>, %arg11: memref<1x32x32xf32, #tpu.memory_space<vmem>>, %arg12: memref<1x1x32xf32, #tpu.memory_space<vmem>>, %arg13: memref<16x32xf32, #tpu.memory_space<vmem>>, %arg14: memref<64x32xf32, #tpu.memory_space<vmem>>, %arg15: memref<!tpu.dma_semaphore, #tpu.memory_space<semaphore_mem>>) attributes {dimension_semantics = [#tpu.dimension_semantics<arbitrary>], iteration_bounds = array<i64: 2>, scalar_prefetch = 1 : i64, scratch_operands = 2 : i64, tpu.core_type = #tpu.core_type<tc>, window_params = [{}, {transform_indices = @transform_1, window_bounds = array<i64: 1, 16, 1>}, {transform_indices = @transform_2, window_bounds = array<i64: 1, 1, 16>}, {transform_indices = @transform_3, window_bounds = array<i64: 1, 16, 4>}, {transform_indices = @transform_4, window_bounds = array<i64: 1, 16, 4>}, {transform_indices = @transform_5, window_bounds = array<i64: 1, 16, 1>}, {transform_indices = @transform_6, window_bounds = array<i64: 1, 32, 32>}, {transform_indices = @transform_7, window_bounds = array<i64: 1, 1, 32>}, {transform_indices = @transform_8, window_bounds = array<i64: 1, 32, 32>}, {transform_indices = @transform_9, window_bounds = array<i64: 1, 32, 32>}, {transform_indices = @transform_10, window_bounds = array<i64: 1, 1, 32>}, {pipeline_mode = #tpu.pipeline_mode<synchronous>, transform_indices = @transform_11, window_bounds = array<i64: 16, 32>}]} {
    %0 = arith.index_cast %arg0 : i32 to index
    %1 = memref.load %arg1[%0] : memref<2xi32, #tpu.memory_space<smem>>
    %c0_i32 = arith.constant 0 : i32
    %2 = arith.cmpi eq, %arg0, %c0_i32 : i32
    %3 = arith.extui %2 : i1 to i32
    %c0_i32_0 = arith.constant 0 : i32
    %4 = arith.cmpi ne, %3, %c0_i32_0 : i32
    scf.if %4 {
      tpu.enqueue_dma source(%arg2 : memref<64x32xf32, #tpu.memory_space<any>>) target(%arg14 : memref<64x32xf32, #tpu.memory_space<vmem>>) target_semaphore(%arg15 : memref<!tpu.dma_semaphore, #tpu.memory_space<semaphore_mem>>)
      tpu.wait_dma2 semaphore(%arg15 : memref<!tpu.dma_semaphore, #tpu.memory_space<semaphore_mem>>) src(%arg2 : memref<64x32xf32, #tpu.memory_space<any>>) dst(%arg14 : memref<64x32xf32, #tpu.memory_space<vmem>>)
    } else {
    }
    %c0 = arith.constant 0 : index
    %c0_1 = arith.constant 0 : index
    %5 = vector.load %arg14[%c0, %c0_1] : memref<64x32xf32, #tpu.memory_space<vmem>>, vector<64x32xf32>
    %6 = tpu.iota {dimensions = array<i32: 1>} : vector<16x64xi32>
    %c0_2 = arith.constant 0 : index
    %c0_3 = arith.constant 0 : index
    %c0_4 = arith.constant 0 : index
    %7 = vector.load %arg3[%c0_2, %c0_3, %c0_4] : memref<1x16x1xi32, #tpu.memory_space<vmem>>, vector<1x16x1xi32>
    %8 = vector.shape_cast %7 : vector<1x16x1xi32> to vector<16x1xi32>
    %9 = vector.broadcast %8 : vector<16x1xi32> to vector<16x64xi32>
    %10 = arith.cmpi eq, %6, %9 : vector<16x64xi32>
    %11 = arith.extui %10 : vector<16x64xi1> to vector<16x64xi32>
    %12 = arith.sitofp %11 : vector<16x64xi32> to vector<16x64xf32>
    %cst = arith.constant dense<0.000000e+00> : vector<16x32xf32>
    %13 = tpu.matmul %12, %5, %cst {dimension_numbers = #tpu.dot_dimension_numbers<[1], [0], [0], [1], [0, 0, 1, 1], [], []>} : vector<16x64xf32>, vector<64x32xf32>, vector<16x32xf32> -> vector<16x32xf32>
    %c0_5 = arith.constant 0 : index
    %c0_6 = arith.constant 0 : index
    %c0_7 = arith.constant 0 : index
    %14 = vector.load %arg8[%c0_5, %c0_6, %c0_7] : memref<1x32x32xf32, #tpu.memory_space<vmem>>, vector<1x32x32xf32>
    %15 = vector.shape_cast %14 : vector<1x32x32xf32> to vector<32x32xf32>
    %cst_8 = arith.constant dense<0.000000e+00> : vector<64x32xf32>
    %16 = tpu.matmul %5, %15, %cst_8 {dimension_numbers = #tpu.dot_dimension_numbers<[1], [0], [0], [1], [0, 0, 1, 1], [], []>} : vector<64x32xf32>, vector<32x32xf32>, vector<64x32xf32> -> vector<64x32xf32>
    %c0_9 = arith.constant 0 : index
    %c0_10 = arith.constant 0 : index
    %c0_11 = arith.constant 0 : index
    %17 = vector.load %arg9[%c0_9, %c0_10, %c0_11] : memref<1x1x32xf32, #tpu.memory_space<vmem>>, vector<1x1x32xf32>
    %18 = vector.shape_cast %17 : vector<1x1x32xf32> to vector<1x32xf32>
    %19 = vector.broadcast %18 : vector<1x32xf32> to vector<64x32xf32>
    %20 = arith.addf %16, %19 : vector<64x32xf32>
    %cst_12 = arith.constant 0.000000e+00 : f32
    %21 = vector.broadcast %cst_12 : f32 to vector<64x32xf32>
    %22 = arith.cmpf ogt, %20, %21 : vector<64x32xf32>
    %cst_13 = arith.constant 0.00999999977 : f32
    %23 = vector.broadcast %cst_13 : f32 to vector<64x32xf32>
    %24 = arith.mulf %23, %20 : vector<64x32xf32>
    %25 = arith.select %22, %20, %24 : vector<64x32xi1>, vector<64x32xf32>
    %c0_14 = arith.constant 0 : index
    %c0_15 = arith.constant 0 : index
    %c0_16 = arith.constant 0 : index
    %26 = vector.load %arg6[%c0_14, %c0_15, %c0_16] : memref<1x16x4xf32, #tpu.memory_space<vmem>>, vector<1x16x4xf32>
    %27 = vector.shape_cast %26 : vector<1x16x4xf32> to vector<16x4xf32>
    %c0_17 = arith.constant 0 : index
    %c0_18 = arith.constant 0 : index
    %c0_19 = arith.constant 0 : index
    %28 = vector.load %arg5[%c0_17, %c0_18, %c0_19] : memref<1x16x4xi32, #tpu.memory_space<vmem>>, vector<1x16x4xi32>
    %29 = vector.shape_cast %28 : vector<1x16x4xi32> to vector<16x4xi32>
    %cst_20 = arith.constant 0.000000e+00 : f32
    %30 = vector.broadcast %cst_20 : f32 to vector<16x64xf32>
    %31 = vector.extract_strided_slice %29 {offsets = [0, 0], sizes = [16, 1], strides = [1, 1]} : vector<16x4xi32> to vector<16x1xi32>
    %32 = vector.broadcast %31 : vector<16x1xi32> to vector<16x64xi32>
    %33 = arith.cmpi eq, %6, %32 : vector<16x64xi32>
    %34 = vector.extract_strided_slice %27 {offsets = [0, 0], sizes = [16, 1], strides = [1, 1]} : vector<16x4xf32> to vector<16x1xf32>
    %cst_21 = arith.constant 0.000000e+00 : f32
    %35 = vector.shape_cast %34 : vector<16x1xf32> to vector<16x1xf32>
    %36 = vector.broadcast %35 : vector<16x1xf32> to vector<16x64xf32>
    %37 = vector.broadcast %cst_21 : f32 to vector<16x64xf32>
    %38 = arith.select %33, %36, %37 : vector<16x64xi1>, vector<16x64xf32>
    %39 = arith.addf %30, %38 : vector<16x64xf32>
    %40 = vector.extract_strided_slice %29 {offsets = [0, 1], sizes = [16, 1], strides = [1, 1]} : vector<16x4xi32> to vector<16x1xi32>
    %41 = vector.broadcast %40 : vector<16x1xi32> to vector<16x64xi32>
    %42 = arith.cmpi eq, %6, %41 : vector<16x64xi32>
    %43 = vector.extract_strided_slice %27 {offsets = [0, 1], sizes = [16, 1], strides = [1, 1]} : vector<16x4xf32> to vector<16x1xf32>
    %cst_22 = arith.constant 0.000000e+00 : f32
    %44 = vector.shape_cast %43 : vector<16x1xf32> to vector<16x1xf32>
    %45 = vector.broadcast %44 : vector<16x1xf32> to vector<16x64xf32>
    %46 = vector.broadcast %cst_22 : f32 to vector<16x64xf32>
    %47 = arith.select %42, %45, %46 : vector<16x64xi1>, vector<16x64xf32>
    %48 = arith.addf %39, %47 : vector<16x64xf32>
    %49 = vector.extract_strided_slice %29 {offsets = [0, 2], sizes = [16, 1], strides = [1, 1]} : vector<16x4xi32> to vector<16x1xi32>
    %50 = vector.broadcast %49 : vector<16x1xi32> to vector<16x64xi32>
    %51 = arith.cmpi eq, %6, %50 : vector<16x64xi32>
    %52 = vector.extract_strided_slice %27 {offsets = [0, 2], sizes = [16, 1], strides = [1, 1]} : vector<16x4xf32> to vector<16x1xf32>
    %cst_23 = arith.constant 0.000000e+00 : f32
    %53 = vector.shape_cast %52 : vector<16x1xf32> to vector<16x1xf32>
    %54 = vector.broadcast %53 : vector<16x1xf32> to vector<16x64xf32>
    %55 = vector.broadcast %cst_23 : f32 to vector<16x64xf32>
    %56 = arith.select %51, %54, %55 : vector<16x64xi1>, vector<16x64xf32>
    %57 = arith.addf %48, %56 : vector<16x64xf32>
    %58 = vector.extract_strided_slice %29 {offsets = [0, 3], sizes = [16, 1], strides = [1, 1]} : vector<16x4xi32> to vector<16x1xi32>
    %59 = vector.broadcast %58 : vector<16x1xi32> to vector<16x64xi32>
    %60 = arith.cmpi eq, %6, %59 : vector<16x64xi32>
    %61 = vector.extract_strided_slice %27 {offsets = [0, 3], sizes = [16, 1], strides = [1, 1]} : vector<16x4xf32> to vector<16x1xf32>
    %cst_24 = arith.constant 0.000000e+00 : f32
    %62 = vector.shape_cast %61 : vector<16x1xf32> to vector<16x1xf32>
    %63 = vector.broadcast %62 : vector<16x1xf32> to vector<16x64xf32>
    %64 = vector.broadcast %cst_24 : f32 to vector<16x64xf32>
    %65 = arith.select %60, %63, %64 : vector<16x64xi1>, vector<16x64xf32>
    %66 = arith.addf %57, %65 : vector<16x64xf32>
    %cst_25 = arith.constant dense<0.000000e+00> : vector<16x32xf32>
    %67 = tpu.matmul %66, %25, %cst_25 {dimension_numbers = #tpu.dot_dimension_numbers<[1], [0], [0], [1], [0, 0, 1, 1], [], []>} : vector<16x64xf32>, vector<64x32xf32>, vector<16x32xf32> -> vector<16x32xf32>
    %c0_26 = arith.constant 0 : index
    %c0_27 = arith.constant 0 : index
    %c0_28 = arith.constant 0 : index
    %68 = vector.load %arg7[%c0_26, %c0_27, %c0_28] : memref<1x16x1xf32, #tpu.memory_space<vmem>>, vector<1x16x1xf32>
    %69 = vector.shape_cast %68 : vector<1x16x1xf32> to vector<16x1xf32>
    %70 = vector.broadcast %69 : vector<16x1xf32> to vector<16x32xf32>
    %71 = arith.mulf %67, %70 : vector<16x32xf32>
    %c0_29 = arith.constant 0 : index
    %c0_30 = arith.constant 0 : index
    %c0_31 = arith.constant 0 : index
    %72 = vector.load %arg10[%c0_29, %c0_30, %c0_31] : memref<1x32x32xf32, #tpu.memory_space<vmem>>, vector<1x32x32xf32>
    %73 = vector.shape_cast %72 : vector<1x32x32xf32> to vector<32x32xf32>
    %cst_32 = arith.constant dense<0.000000e+00> : vector<16x32xf32>
    %74 = tpu.matmul %13, %73, %cst_32 {dimension_numbers = #tpu.dot_dimension_numbers<[1], [0], [0], [1], [0, 0, 1, 1], [], []>} : vector<16x32xf32>, vector<32x32xf32>, vector<16x32xf32> -> vector<16x32xf32>
    %c0_33 = arith.constant 0 : index
    %c0_34 = arith.constant 0 : index
    %c0_35 = arith.constant 0 : index
    %75 = vector.load %arg11[%c0_33, %c0_34, %c0_35] : memref<1x32x32xf32, #tpu.memory_space<vmem>>, vector<1x32x32xf32>
    %76 = vector.shape_cast %75 : vector<1x32x32xf32> to vector<32x32xf32>
    %cst_36 = arith.constant dense<0.000000e+00> : vector<16x32xf32>
    %77 = tpu.matmul %71, %76, %cst_36 {dimension_numbers = #tpu.dot_dimension_numbers<[1], [0], [0], [1], [0, 0, 1, 1], [], []>} : vector<16x32xf32>, vector<32x32xf32>, vector<16x32xf32> -> vector<16x32xf32>
    %78 = arith.addf %74, %77 : vector<16x32xf32>
    %c0_37 = arith.constant 0 : index
    %c0_38 = arith.constant 0 : index
    %c0_39 = arith.constant 0 : index
    %79 = vector.load %arg12[%c0_37, %c0_38, %c0_39] : memref<1x1x32xf32, #tpu.memory_space<vmem>>, vector<1x1x32xf32>
    %80 = vector.shape_cast %79 : vector<1x1x32xf32> to vector<1x32xf32>
    %81 = vector.broadcast %80 : vector<1x32xf32> to vector<16x32xf32>
    %82 = arith.addf %78, %81 : vector<16x32xf32>
    %cst_40 = arith.constant 0.000000e+00 : f32
    %83 = vector.broadcast %cst_40 : f32 to vector<16x32xf32>
    %84 = arith.cmpf ogt, %82, %83 : vector<16x32xf32>
    %cst_41 = arith.constant 0.00999999977 : f32
    %85 = vector.broadcast %cst_41 : f32 to vector<16x32xf32>
    %86 = arith.mulf %85, %82 : vector<16x32xf32>
    %87 = arith.select %84, %82, %86 : vector<16x32xi1>, vector<16x32xf32>
    %88 = arith.mulf %87, %87 : vector<16x32xf32>
    %cst_42 = arith.constant dense<0.000000e+00> : vector<16xf32>
    %89 = vector.multi_reduction <add>, %88, %cst_42 [1] : vector<16x32xf32> to vector<16xf32>
    %90 = vector.shape_cast %89 : vector<16xf32> to vector<16x1xf32>
    %cst_43 = arith.constant 0.000000e+00 : f32
    %91 = vector.broadcast %cst_43 : f32 to vector<16x1xf32>
    %92 = arith.cmpf oeq, %90, %91 : vector<16x1xf32>
    %93 = math.rsqrt %90 : vector<16x1xf32>
    %cst_44 = arith.constant 1.000000e+00 : f32
    %94 = vector.broadcast %cst_44 : f32 to vector<16x1xf32>
    %95 = arith.select %92, %94, %93 : vector<16x1xi1>, vector<16x1xf32>
    %96 = vector.broadcast %95 : vector<16x1xf32> to vector<16x32xf32>
    %97 = arith.mulf %87, %96 : vector<16x32xf32>
    %98 = tpu.iota {dimensions = array<i32: 0>} : vector<64x16xi32>
    %99 = tpu.iota {dimensions = array<i32: 1>} : vector<64x16xi32>
    %c0_45 = arith.constant 0 : index
    %c0_46 = arith.constant 0 : index
    %c0_47 = arith.constant 0 : index
    %100 = vector.load %arg4[%c0_45, %c0_46, %c0_47] : memref<1x1x16xi32, #tpu.memory_space<vmem>>, vector<1x1x16xi32>
    %101 = vector.shape_cast %100 : vector<1x1x16xi32> to vector<1x16xi32>
    %102 = vector.broadcast %101 : vector<1x16xi32> to vector<64x16xi32>
    %103 = arith.cmpi eq, %98, %102 : vector<64x16xi32>
    %104 = vector.broadcast %1 : i32 to vector<64x16xi32>
    %105 = arith.cmpi slt, %99, %104 : vector<64x16xi32>
    %106 = arith.andi %103, %105 : vector<64x16xi1>
    %cst_48 = arith.constant 1.000000e+00 : f32
    %cst_49 = arith.constant 0.000000e+00 : f32
    %107 = vector.broadcast %cst_48 : f32 to vector<64x16xf32>
    %108 = vector.broadcast %cst_49 : f32 to vector<64x16xf32>
    %109 = arith.select %106, %107, %108 : vector<64x16xi1>, vector<64x16xf32>
    %cst_50 = arith.constant dense<0.000000e+00> : vector<64x32xf32>
    %110 = tpu.matmul %109, %97, %cst_50 {dimension_numbers = #tpu.dot_dimension_numbers<[1], [0], [0], [1], [0, 0, 1, 1], [], []>} : vector<64x16xf32>, vector<16x32xf32>, vector<64x32xf32> -> vector<64x32xf32>
    %cst_51 = arith.constant dense<0.000000e+00> : vector<64xf32>
    %111 = vector.multi_reduction <add>, %109, %cst_51 [1] : vector<64x16xf32> to vector<64xf32>
    %112 = vector.shape_cast %111 : vector<64xf32> to vector<64x1xf32>
    %cst_52 = arith.constant 0.000000e+00 : f32
    %113 = vector.broadcast %cst_52 : f32 to vector<64x1xf32>
    %114 = arith.cmpf ogt, %112, %113 : vector<64x1xf32>
    %115 = vector.shape_cast %114 : vector<64x1xi1> to vector<64x1xi1>
    %116 = vector.broadcast %115 : vector<64x1xi1> to vector<64x32xi1>
    %117 = arith.select %116, %110, %5 : vector<64x32xi1>, vector<64x32xf32>
    %c0_53 = arith.constant 0 : index
    %c0_54 = arith.constant 0 : index
    %118 = vector.load %arg14[%c0_53, %c0_54] : memref<64x32xf32, #tpu.memory_space<vmem>>, vector<64x32xf32>
    tpu.vector_store %arg14[%c0_53, %c0_54], %117 {strides = array<i32>} : memref<64x32xf32, #tpu.memory_space<vmem>>, vector<64x32xf32>,
    %c1_i32 = arith.constant 1 : i32
    %119 = arith.cmpi eq, %arg0, %c1_i32 : i32
    %120 = arith.extui %119 : i1 to i32
    %c0_i32_55 = arith.constant 0 : i32
    %121 = arith.cmpi ne, %120, %c0_i32_55 : i32
    scf.if %121 {
      %c0_56 = arith.constant 0 : index
      %c0_57 = arith.constant 0 : index
      %122 = vector.load %arg13[%c0_56, %c0_57] : memref<16x32xf32, #tpu.memory_space<vmem>>, vector<16x32xf32>
      tpu.vector_store %arg13[%c0_56, %c0_57], %97 {strides = array<i32>} : memref<16x32xf32, #tpu.memory_space<vmem>>, vector<16x32xf32>,
    } else {
    }
    return
  }
  func.func @transform_1(%arg0: i32, %arg1: memref<2xi32, #tpu.memory_space<smem>>) -> (i32, i32, i32) {
    %c0_i32 = arith.constant 0 : i32
    %c0_i32_0 = arith.constant 0 : i32
    %c0_i32_1 = arith.constant 0 : i32
    return %arg0, %c0_i32, %c0_i32_0 : i32, i32, i32
  }
  func.func @transform_2(%arg0: i32, %arg1: memref<2xi32, #tpu.memory_space<smem>>) -> (i32, i32, i32) {
    %c0_i32 = arith.constant 0 : i32
    %c0_i32_0 = arith.constant 0 : i32
    %c0_i32_1 = arith.constant 0 : i32
    return %arg0, %c0_i32, %c0_i32_0 : i32, i32, i32
  }
  func.func @transform_3(%arg0: i32, %arg1: memref<2xi32, #tpu.memory_space<smem>>) -> (i32, i32, i32) {
    %c0_i32 = arith.constant 0 : i32
    %c0_i32_0 = arith.constant 0 : i32
    %c0_i32_1 = arith.constant 0 : i32
    return %arg0, %c0_i32, %c0_i32_0 : i32, i32, i32
  }
  func.func @transform_4(%arg0: i32, %arg1: memref<2xi32, #tpu.memory_space<smem>>) -> (i32, i32, i32) {
    %c0_i32 = arith.constant 0 : i32
    %c0_i32_0 = arith.constant 0 : i32
    %c0_i32_1 = arith.constant 0 : i32
    return %arg0, %c0_i32, %c0_i32_0 : i32, i32, i32
  }
  func.func @transform_5(%arg0: i32, %arg1: memref<2xi32, #tpu.memory_space<smem>>) -> (i32, i32, i32) {
    %c0_i32 = arith.constant 0 : i32
    %c0_i32_0 = arith.constant 0 : i32
    %c0_i32_1 = arith.constant 0 : i32
    return %arg0, %c0_i32, %c0_i32_0 : i32, i32, i32
  }
  func.func @transform_6(%arg0: i32, %arg1: memref<2xi32, #tpu.memory_space<smem>>) -> (i32, i32, i32) {
    %c0_i32 = arith.constant 0 : i32
    %c0_i32_0 = arith.constant 0 : i32
    %c0_i32_1 = arith.constant 0 : i32
    return %arg0, %c0_i32, %c0_i32_0 : i32, i32, i32
  }
  func.func @transform_7(%arg0: i32, %arg1: memref<2xi32, #tpu.memory_space<smem>>) -> (i32, i32, i32) {
    %c0_i32 = arith.constant 0 : i32
    %c0_i32_0 = arith.constant 0 : i32
    %c0_i32_1 = arith.constant 0 : i32
    return %arg0, %c0_i32, %c0_i32_0 : i32, i32, i32
  }
  func.func @transform_8(%arg0: i32, %arg1: memref<2xi32, #tpu.memory_space<smem>>) -> (i32, i32, i32) {
    %c0_i32 = arith.constant 0 : i32
    %c0_i32_0 = arith.constant 0 : i32
    %c0_i32_1 = arith.constant 0 : i32
    return %arg0, %c0_i32, %c0_i32_0 : i32, i32, i32
  }
  func.func @transform_9(%arg0: i32, %arg1: memref<2xi32, #tpu.memory_space<smem>>) -> (i32, i32, i32) {
    %c0_i32 = arith.constant 0 : i32
    %c0_i32_0 = arith.constant 0 : i32
    %c0_i32_1 = arith.constant 0 : i32
    return %arg0, %c0_i32, %c0_i32_0 : i32, i32, i32
  }
  func.func @transform_10(%arg0: i32, %arg1: memref<2xi32, #tpu.memory_space<smem>>) -> (i32, i32, i32) {
    %c0_i32 = arith.constant 0 : i32
    %c0_i32_0 = arith.constant 0 : i32
    %c0_i32_1 = arith.constant 0 : i32
    return %arg0, %c0_i32, %c0_i32_0 : i32, i32, i32
  }
  func.func @transform_11(%arg0: i32, %arg1: memref<2xi32, #tpu.memory_space<smem>>) -> (i32, i32) {
    %c0_i32 = arith.constant 0 : i32
    %c0_i32_0 = arith.constant 0 : i32
    %c0_i32_1 = arith.constant 0 : i32
    return %c0_i32, %c0_i32_0 : i32, i32
  }
}

</mosaic_0001>

<bundles_post_ra>
// kernel: tpu_custom_call.1
= control target key start
LH: loop header
LB: loop body
LE: loop exit
PB: predicated region body
PF: predicated region fallthrough
CT: control target
= control target key end

     0   :  { %s1575_s24 = smov [#allocation5]   ;;  %s2072_s0 = inlined_call_operand.vmem [shape: s32[2], index: 0, kind: input, shape index: {}]   ;;  %s2073_s1 = inlined_call_operand.vmem [shape: f32[64,32], index: 1, kind: input, shape index: {}]   ;;  %s2074_s2 = inlined_call_operand.vmem [shape: s32[2,16,1], index: 2, kind: input, shape index: {}]   ;;  %s2075_s3 = inlined_call_operand.vmem [shape: s32[2,1,16], index: 3, kind: input, shape index: {}]   ;;  %s2076_s4 = inlined_call_operand.vmem [shape: s32[2,16,4], index: 4, kind: input, shape index: {}]   ;;  %s2077_s5 = inlined_call_operand.vmem [shape: f32[2,16,4], index: 5, kind: input, shape index: {}]   ;;  %s2078_s6 = inlined_call_operand.vmem [shape: f32[2,16,1], index: 6, kind: input, shape index: {}]   ;;  %s2079_s7 = inlined_call_operand.vmem [shape: f32[2,32,32], index: 7, kind: input, shape index: {}]   ;;  %s2080_s8 = inlined_call_operand.vmem [shape: f32[2,1,32], index: 8, kind: input, shape index: {}]   ;;  %s2081_s9 = inlined_call_operand.vmem [shape: f32[2,32,32], index: 9, kind: input, shape index: {}]   ;;  %s2082_s10 = inlined_call_operand.hbm [shape: f32[2,32,32], index: 10, kind: input, shape index: {}]   ;;  %s2083_s11 = inlined_call_operand.vmem [shape: f32[2,1,32], index: 11, kind: input, shape index: {}]   ;;  %s2084_s12 = inlined_call_operand.hbm [shape: f32[16,32], index: 12, kind: output, shape index: {}]  }
   0x1   :  { %2089 = sst [smem:[#allocation19_spill]] %s2074_s2  ;;  %s18_s23 = sshll.u32 %s2072_s0, 4  ;;  %s19_s23 = int_to_ptr.vmem [resolvable:$true] %s18_s23 }
   0x2   :  { %2090 = sst [smem:[#allocation20_spill]] %s2076_s4 }
   0x3   :  { %2091 = sst [smem:[#allocation21_spill]] %s2077_s5 }
   0x4   :  { %2092 = sst [smem:[#allocation22_spill]] %s2082_s10 }
   0x5   :  { %21 = dma.vmem_to_smem %s19_s23, 16, %s1575_s24, [#allocation4] }
   0x6   :  { %1547 = dma.done.wait [#allocation4], 16 }
   0x7   :  { %1548 = vsyncadd [#allocation4], 4294967280 }
   0x8   :  { %24 = sfence }
   0x9   :  { %25 = vsyncpa [#allocation7], 0 }
   0xa   :  { %27 = vsyncpa [#allocation7 + $0x1], 0 }
   0xb   :  { %28 = vsyncpa [#allocation8], 0  ;;  %s1654_s25 = smov 0   ;;  %s1656_s26 = smov 0  }
   0xc   :  { %s1658_s27 = smov 0   ;;  %s1660_s28 = smov 0  }
   0xd LB: > { %2093 = sst [smem:[#allocation15_spill]] %s1565_s26  ;;  %s1673_s0 = sadd.s32 4294967295, %s1573_s28   ;;  %s1573_s28 = sphi %s1660_s28, %s2109_s28   ;;  %s1569_s27 = sphi %s1658_s27, %s2112_s27   ;;  %s1565_s26 = sphi %s1656_s26, %s2111_s26   ;;  %s1561_s25 = sphi %s1654_s25, %s2110_s25  }
   0xe   : > { %2094 = sst [smem:[#allocation16_spill]] %s1569_s27  ;;  %s1676_s29 = sadd.s32 1, %s1573_s28  }
   0xf   : > { %2095 = sst [smem:[#allocation17_spill]] %s1676_s29  ;;  %s246_s30 = ssub.s32 %s1573_s28, %s1676_s29 }
  0x10   : > { %s249_s13 = sadd.s32 1, %s1569_s27  ;;  %p247_p0 = scmp.eq.s32.totalorder %s246_s30, 0 }
  0x11   : > { %p256_p1 = scmp.ne.s32.totalorder %s1569_s27, %s1565_s26  ;;  %p257_p2 = scmp.eq.s32.totalorder %s1573_s28, 0 }
  0x12   : > { %p262_p3 = scmp.ne.s32.totalorder %s1565_s26, %s1561_s25  ;;  %p263_p5 = scmp.eq.s32.totalorder %s1673_s0, 0 }
  0x13   : > { %s1686_s14 = scalar_select %p247_p0, %s1569_s27, %s249_s13  }
  0x14   : > { %p1688_p4 = por %p257_p2, %p256_p1  ;;  %p1392_p6 = scmp.lt.s32.totalorder %s1573_s28, 2 }
  0x15   : > { %2096 = sst [smem:[#allocation18_spill]] %s1686_s14  ;;  %p1694_p7 = por %p263_p5, %p262_p3 }
  0x16   : > { %s393_s17 = sand.u32 1, %s1569_s27   ;;  %s1369_s19 = sshll.u32 %s1573_s28, 5 }
  0x17   : > { %s1319_s18 = sshll.u32 %s393_s17, 5  ;;  %s2099_s10 = sld [smem:[#allocation22_spill]] }
  0x18   : > { %s397_s23 = scalar_lea.vmem [#allocation6], %s1319_s18  ;;  %p1705_p8 = pnand %p1392_p6, %p1688_p4 }
  0x19   : > { %s405_s24 = sshll.u32 %s397_s23, 4  ;;  %p1322_p9 = scmp.ge.s32.totalorder %s1573_s28, 1  ;;  %s406_s24 = int_to_ptr.vmem [resolvable:$true] %s405_s24 }
  0x1a   : > { %s394_s13 = scalar_lea.sflag [#allocation7], %s393_s17  ;;  %p1477_p11 = pneg %p1705_p8 }
  0x1d   : > { %s402_s22 = scalar_lea.hbm %s2099_s10, %s1369_s19  ;;  %s1480_s20 = scalar_lea.hbm %s2099_s10, 64 }
  0x1e   : > { %s403_s25 = sshll.u32 %s402_s22, 4  ;;  %s404_s25 = int_to_ptr.hbm [resolvable:$true] %s403_s25 }
  0x1f   : > { %s1473_s14 = sshra.s32 %s404_s25, 4  ;;  %s1474_s14 = int_to_ptr.hbm [resolvable:$true] %s1473_s14 }
  0x20   : > { %s1475_s27 = scalar_lea.hbm %s1474_s14, 32  ;;  %p1481_p0 = scmp.lt.s32.totalorder %s1474_s14, %s2099_s10 }
  0x21   : > { %p1476_p10 = scmp.ne.s32.totalorder %s1474_s14, %s1475_s27  ;;  %p1482_p1 = scmp.lt.s32.totalorder %s1480_s20, %s1475_s27 }
  0x23   : > { %p1478_p12 = pnand %p1477_p11, %p1476_p10  ;;  %p1483_p2 = por %p1482_p1, %p1481_p0 }
  0x25   : > { %p1479_p13 = pneg %p1478_p12 }
  0x27   : > { %p1484_p3 = pnand %p1483_p2, %p1479_p13 }
  0x29   : > { %1487 = shalt.err (!%p1484_p3)
}
  0x2a   : > { %s1576_s17 = smov 128   ;;  %s1577_s22 = smov 8  }
  0x2b   : > { %1391 = dma.hbm_to_vmem [thread:$0]  (!%p1705_p8), %s404_s25, 512, %s406_s24, %s394_s13, %s1576_s17, %s1576_s17, %s1577_s22  }
  0x2c   : > { %p419_p4 = scmp.lt.s32.totalorder %s1573_s28, 3 }
  0x2e   : > { %p420_p5 = pnand %p1322_p9, %p419_p4 }
  0x2f   : > { %s425_s23 = sand.u32 (!%p420_p5), 1, %s1565_s26  }
  0x30   : > { %423 = sbr.rel (%p420_p5) target bundleno = 885 (0x375), region = 60  ;;  %s1323_s18 = sshll.u32 (!%p420_p5), %s425_s23, 5 }
  0x31   : > { %s426_s14 = scalar_lea.sflag (!%p420_p5), [#allocation7], %s425_s23  ;;  %s1724_s27 = scalar_lea.vmem (!%p420_p5), [#allocation6], %s1323_s18 }
  0x35   : > { %1550 = dma.done.wait (%p1694_p7), %s426_s14, 512  }
  0x36   : > { %1552 = vsyncadd (%p1694_p7), %s426_s14, 4294966784  ;;  %p501_p6 = scmp.lt.s32.totalorder %s1673_s0, 1  ;;  %s1732_s24 = sld [smem:[#allocation5 + %s1673_s0]] }
  0x37   : > { %s2101_s2 = sld [smem:[#allocation19_spill]]  ;;  %p1336_p7 = scmp.ne.s32.totalorder %s1673_s0, 0 }
  0x38   : > { %s1735_s28 = scalar_select %p501_p6, %s1673_s0, 1 }
  0x39   : > { %s2102_s4 = sld [smem:[#allocation20_spill]] }
  0x3a   : > { %s1370_s25 = sshll.u32 %s1735_s28, 4  ;;  %s2103_s5 = sld [smem:[#allocation21_spill]] }
  0x3b   : > { %s1760_s30 = scalar_lea.vmem %s2078_s6, %s1370_s25  ;;  %s1374_s13 = sshll.u32 %s1735_s28, 5 }
  0x3c   : > { %s531_s20 = scalar_lea.vmem %s2080_s8, %s1735_s28  ;;  %s1770_s21 = scalar_lea.vmem %s2079_s7, %s1374_s13 }
  0x3d   : > { %s1745_s15 = scalar_lea.vmem %s2101_s2, %s1370_s25  ;;  %s1775_s23 = scalar_lea.vmem %s2081_s9, %s1374_s13 }
  0x3e   : > { %s539_s10 = scalar_lea.vmem %s2083_s11, %s1735_s28  ;;  %544 = sbr.rel (%p1336_p7) target bundleno = 79 (0x4f), region = 68 }
  0x3f   : > { %s1750_s22 = scalar_lea.vmem %s2102_s4, %s1370_s25 }
  0x40   : > { %s1755_s14 = scalar_lea.vmem %s2103_s5, %s1370_s25 }
  0x43   : > { %v555_v0 = vld [vmem:[%s2073_s1] sm:$0xff]  ;;  %v557_v1 = vld [vmem:[%s2073_s1 + $0x8] sm:$0xff]  ;;  %v559_v2 = vld [vmem:[%s2073_s1 + $0x10] sm:$0xff] }
  0x44   : > { %556 = vst [vmem:[#allocation2] sm:$0xff] %v555_v0  ;;  %v561_v3 = vld [vmem:[%s2073_s1 + $0x18] sm:$0xff]  ;;  %v563_v4 = vld [vmem:[%s2073_s1 + $0x20] sm:$0xff]  ;;  %v565_v5 = vld [vmem:[%s2073_s1 + $0x28] sm:$0xff] }
  0x45   : > { %558 = vst [vmem:[#allocation2 + $0x8] sm:$0xff] %v557_v1  ;;  %v567_v6 = vld [vmem:[%s2073_s1 + $0x30] sm:$0xff]  ;;  %v569_v7 = vld [vmem:[%s2073_s1 + $0x38] sm:$0xff] }
  0x46   : > { %560 = vst [vmem:[#allocation2 + $0x10] sm:$0xff] %v559_v2 }
  0x47   : > { %562 = vst [vmem:[#allocation2 + $0x18] sm:$0xff] %v561_v3 }
  0x48   : > { %564 = vst [vmem:[#allocation2 + $0x20] sm:$0xff] %v563_v4 }
  0x49   : > { %566 = vst [vmem:[#allocation2 + $0x28] sm:$0xff] %v565_v5 }
  0x4a   : > { %568 = vst [vmem:[#allocation2 + $0x30] sm:$0xff] %v567_v6 }
  0x4b   : > { %570 = vst [vmem:[#allocation2 + $0x38] sm:$0xff] %v569_v7 }
  0x4c   : > { %576 = vsyncadd [#allocation3], 1024 }
  0x4d   : > { %1553 = dma.done.wait [#allocation3], 1024 }
  0x4e   : > { %1554 = vsyncadd [#allocation3], 4294966272 }
  0x4f PF: > { %v637_v8 = vld [vmem:[%s1770_s21 + $0x18] sm:$0xff]  ;;  %v636_v9 = vld [vmem:[%s1770_s21 + $0x10] sm:$0xff]  ;;  %v1578_v10 = vmov 0   ;;  %v635_v11 = vld [vmem:[%s1770_s21 + $0x8] sm:$0xff]  ;;  %v1579_v13 = vmov 1   ;;  %vm642_vm0 = vcmask 261120   ;;  %v588_v52 = vlaneseq }
  0x50   : > { %679 = vmatpush.msra.mxu1 %v637_v8  ;;  %1440 = vset.pattern.permute.xlu1 %v1578_v10  ;;  %v732_v12 = vld [vmem:[%s1755_s14] sm:$0xff]  ;;  %v1823_v18 = vld [vmem:[#allocation2 + $0x8] sm:$0xff]  ;;  %v1580_v20 = vmov 2   ;;  %v1581_v23 = vmov 3   ;;  %v1835_v24 = vld [vmem:[#allocation2 + $0x10] sm:$0xff]  ;;  %vm604_vm3 = vcmask 523264  }
  0x51   : > { %1438 = vset.pattern.permute.xlu0 %v1579_v13  ;;  %1376 = vmatpush.msra.mxu3 %v637_v8  ;;  %v734_v14 = vld [vmem:[%s1750_s22] sm:$0xff]  ;;  %v1827_v19 = vld [vmem:[#allocation2 + $0x30] sm:$0xff]  ;;  %v1830_v21 = vld [vmem:[#allocation2 + $0x28] sm:$0xff]  ;;  %v1888_v54 = vand.u32 127, %v588_v52  ;;  %v1582_v61 = vmov 0.0   ;;  %p1363_p8 = scmp.ne.s32.totalorder %s1673_s0, 1 }
  0x52   : > { %680 = vmatpush.msra.mxu1 %v636_v9  ;;  %746 = vperm.xlu1 %1440, %v732_v12   ;;  %v634_v15 = vld [vmem:[%s1770_s21] sm:$0xff]  ;;  %v1817_v17 = vld [vmem:[#allocation2 + $0x38] sm:$0xff]  ;;  %v735_v26 = vld [vmem:[%s1750_s22 + $0x8] sm:$0xff]  ;;  %s2104_s21 = scalar_lea.vmem %s2075_s3, %s1735_s28 }
  0x53   : > { %759 = vperm.xlu0 %1438, %v734_v14   ;;  %1377 = vmatpush.msra.mxu3 %v636_v9  ;;  %v1813_v16 = vld [vmem:[#allocation2] sm:$0xff]  ;;  %v1838_v25 = vld [vmem:[#allocation2 + $0x18] sm:$0xff]  ;;  %v733_v27 = vld [vmem:[%s1755_s14 + $0x8] sm:$0xff] }
  0x54   : > { %681 = vmatpush.msra.mxu1 %v635_v11  ;;  %619 = vmatpush.msra.mxu0 %v1817_v17  ;;  %v1833_v22 = vld [vmem:[#allocation2 + $0x20] sm:$0xff]  ;;  %v848_v29 = vld [vmem:[%s1760_s30 + $0x8] sm:$0xff]  ;;  %v868_v58 = vld [vmem:[%s1724_s27 + $0x18] sm:$0xff] }
  0x55   : > { %1378 = vmatpush.msra.mxu3 %v635_v11  ;;  %1442 = vset.pattern.permute.xlu2 %v1580_v20  ;;  %v590_v28 = vld [vmem:[%s1745_s15] sm:$0xff]  ;;  %v591_v30 = vld [vmem:[%s1745_s15 + $0x8] sm:$0xff]  ;;  %v867_v59 = vld [vmem:[%s1724_s27 + $0x10] sm:$0xff] }
  0x56   : > { %682 = vmatpush.msra.mxu1 %v634_v15  ;;  %620 = vmatpush.msra.mxu0 %v1827_v19  ;;  %v1874_v37 = vld [vmem:[%s531_s20] ss:$0 sm:$0xff]  ;;  %v866_v63 = vld [vmem:[%s1724_s27 + $0x8] sm:$0xff] }
  0x57   : > { %1341 = vmatmul.msk.f32.vlgmr.msra.gmra.mxu1 %vm642_vm0, %v1813_v16  ;;  %1379 = vmatpush.msra.mxu3 %v634_v15  ;;  %v847_v57 = vld [vmem:[%s1760_s30] sm:$0xff] }
  0x58   : > { %1348 = vmatmul.msk.f32.vlgmr.msra.gmra.mxu3 %vm642_vm0, %v1817_v17  ;;  %779 = vperm.xlu2 %1442, %v734_v14  }
  0x59   : > { %621 = vmatpush.msra.mxu0 %v1830_v21  ;;  %887 = vmatpush.msrb.mxu3 %v868_v58 }
  0x5a   : > { %1441 = vset.pattern.permute.xlu1 %v1579_v13 }
  0x5b   : > { %767 = vperm.xlu1 %1441, %v732_v12   ;;  %1439 = vset.pattern.permute.xlu0 %v1578_v10 }
  0x5c   : > { %737 = vperm.xlu0 %1439, %v734_v14   ;;  %622 = vmatpush.msra.mxu0 %v1833_v22 }
  0x5d   : > { %888 = vmatpush.msrb.mxu3 %v867_v59 }
  0x5e   : > { %623 = vmatpush.msra.mxu0 %v1838_v25 }
  0x5f   : > { %1342 = vmatmul.msk.f32.gmra.mxu1 %vm642_vm0, %v1823_v18  ;;  %889 = vmatpush.msrb.mxu3 %v866_v63 }
  0x60   : > { %624 = vmatpush.msra.mxu0 %v1835_v24  ;;  %787 = vperm.xlu2 %1442, %v732_v12  }
  0x62   : > { %625 = vmatpush.msra.mxu0 %v1823_v18 }
  0x63   : > { %1443 = vset.pattern.permute.xlu1 %v1581_v23 }
  0x64   : > { %799 = vperm.xlu1 %1443, %v734_v14   ;;  %740 = vperm.xlu0 %1439, %v735_v26  }
  0x65   : > { %626 = vmatpush.msra.mxu0 %v1813_v16 }
  0x67   : > { %1343 = vmatmul.msk.f32.gmra.mxu1 %vm642_vm0, %v1835_v24 }
  0x68   : > { %1444 = vset.pattern.permute.xlu2 %v1581_v23 }
  0x69   : > { %807 = vperm.xlu2 %1444, %v732_v12  }
  0x6c   : > { %1445 = vset.pattern.permute.xlu1 %v1579_v13  ;;  %1448 = vset.pattern.permute.xlu0 %v1580_v20 }
  0x6d   : > { %762 = vperm.xlu1 %1445, %v735_v26   ;;  %791 = vperm.xlu0 %1448, %v733_v27  }
  0x6f   : > { %1344 = vmatmul.msk.f32.gmra.mxu1 %vm642_vm0, %v1838_v25 }
  0x71   : > { %1446 = vset.pattern.permute.xlu2 %v1578_v10 }
  0x72   : > { %751 = vperm.xlu2 %1446, %v733_v27  }
  0x75   : > { %771 = vperm.xlu1 %1445, %v733_v27   ;;  %1453 = vset.pattern.permute.xlu0 %v1578_v10 }
  0x76   : > { %851 = vperm.xlu0 %1453, %v847_v57  }
  0x77   : > { %1345 = vmatmul.msk.f32.gmra.mxu1 %vm642_vm0, %v1833_v22 }
  0x7a   : > { %1447 = vset.pattern.permute.xlu2 %v1580_v20 }
  0x7b   : > { %782 = vperm.xlu2 %1447, %v735_v26  }
  0x7d   : > { %1449 = vset.pattern.permute.xlu1 %v1581_v23 }
  0x7e   : > { %802 = vperm.xlu1 %1449, %v735_v26  }
  0x7f   : > { %1346 = vmatmul.msk.f32.gmra.mxu1 %vm642_vm0, %v1830_v21 }
  0x83   : > { %1450 = vset.pattern.permute.xlu2 %v1581_v23 }
  0x84   : > { %811 = vperm.xlu2 %1450, %v733_v27  }
  0x86   : > { %1451 = vset.pattern.permute.xlu1 %v1578_v10 }
  0x87   : > { %1347 = vmatmul.msk.f32.gmra.mxu1 %vm642_vm0, %v1827_v19  ;;  %593 = vperm.xlu1 %1451, %v590_v28  }
  0x8c   : > { %1452 = vset.pattern.permute.xlu2 %v1578_v10 }
  0x8d   : > { %596 = vperm.xlu2 %1452, %v591_v30  }
  0x8f   : > { %856 = vperm.xlu1 %1451, %v848_v29  }
  0xb2   : > { %v1865_v34 = vpop.permute.xlu2 %779 }
  0xb3   : > { %vm784_vm8 = vcmp.eq.s32.totalorder %v1888_v54, %v1865_v34 }
  0xba   : > { %v788_v40 = vpop.permute.xlu2 %787 }
  0xbb   : > { %v794_v27 = vsel %vm784_vm8, %v788_v40, 0.0 }
  0xc3   : > { %v1879_v46 = vpop.permute.xlu2 %807 }
  0xc4   : > { %v747_v31 = vpop.permute.xlu1 %746 }
  0xc5   : > { %v760_v50 = vpop.permute.xlu0 %759 }
  0xc6   : > { %vm764_vm4 = vcmp.eq.s32.totalorder %v1888_v54, %v760_v50  ;;  %v864_v50 = vld [vmem:[%s1775_s23 + $0x18] sm:$0xff] }
  0xcc   : > { %v1883_v49 = vpop.permute.xlu2 %751 }
  0xcd   : > { %v768_v32 = vpop.permute.xlu1 %767 }
  0xce   : > { %v738_v60 = vpop.permute.xlu0 %737  ;;  %v774_v7 = vsel %vm764_vm4, %v768_v32, 0.0 }
  0xcf   : > { %vm742_vm5 = vcmp.eq.s32.totalorder %v1888_v54, %v738_v60 }
  0xd0   : > { %v754_v10 = vsel %vm742_vm5, %v747_v31, 0.0 }
  0xd1   : > { %v776_v23 = vadd.f32 %v774_v7, %v754_v10 }
  0xd3   : > { %v796_v32 = vadd.f32 %v794_v27, %v776_v23  ;;  %v1958_v27 = vld [vmem:[%s2104_s21] ss:$0 sm:$0xff] }
  0xd4   : > { %v1863_v33 = vpop.f32.mrf.mxu1 }
  0xd5   : > { %v1890_v55 = vpop.permute.xlu2 %782  ;;  %v685_v26 = vadd.f32 %v1874_v37, %v1863_v33 }
  0xd6   : > { %v1867_v35 = vpop.permute.xlu1 %799  ;;  %v741_v11 = vpop.permute.xlu0 %740  ;;  %vm785_vm4 = vcmp.eq.s32.totalorder %v1888_v54, %v1890_v55  ;;  %v862_v55 = vld [vmem:[%s1775_s23 + $0x8] sm:$0xff] }
  0xd7   : > { %vm804_vm11 = vcmp.eq.s32.totalorder %v1888_v54, %v1867_v35  ;;  %vm743_vm14 = vcmp.eq.s32.totalorder %v1888_v54, %v741_v11 }
  0xd8   : > { %v814_v35 = vsel %vm804_vm11, %v1879_v46, 0.0 }
  0xdb   : > { %v705_v38 = vpop.f32.mrf.mxu3 }
  0xdc   : > { %v687_v36 = vpop.f32.mrf.mxu1  ;;  %v706_v39 = vadd.f32 %v1874_v37, %v705_v38 }
  0xdd   : > { %v688_v14 = vadd.f32 %v1874_v37, %v687_v36  ;;  %v716_v36 = vmul.f32 0.01, %v685_v26 }
  0xde   : > { %v723_v42 = vmul.f32 0.01, %v706_v39  ;;  %vm715_vm1 = vcmp.gt.f32.partialorder %v706_v39, 0.0  ;;  %v812_v8 = vpop.permute.xlu2 %811 }
  0xdf   : > { %v1877_v41 = vpop.permute.xlu1 %762  ;;  %v717_v31 = vmul.f32 0.01, %v688_v14  ;;  %vm709_vm15 = vcmp.gt.f32.partialorder %v688_v14, 0.0  ;;  %v792_v40 = vpop.permute.xlu0 %791 }
  0xe0   : > { %v731_v44 = vsel %vm715_vm1, %v706_v39, %v723_v42  ;;  %vm765_vm13 = vcmp.eq.s32.totalorder %v1888_v54, %v1877_v41  ;;  %vm708_vm1 = vcmp.gt.f32.partialorder %v685_v26, 0.0  ;;  %v816_v42 = vadd.f32 %v814_v35, %v796_v32 }
  0xe1   : > { %832 = vmatpush.msra.mxu2 %v731_v44  ;;  %v725_v41 = vsel %vm709_vm15, %v688_v14, %v717_v31  ;;  %v724_v44 = vsel %vm708_vm1, %v685_v26, %v716_v36  ;;  %v974_v26 = vshrl.u32 %v588_v52, 7 }
  0xe4   : > { %v690_v43 = vpop.f32.mrf.mxu1 }
  0xe5   : > { %v691_v9 = vadd.f32 %v1874_v37, %v690_v43 }
  0xe7   : > { %v1881_v47 = vpop.permute.xlu1 %771  ;;  %v718_v29 = vmul.f32 0.01, %v691_v9  ;;  %vm710_vm12 = vcmp.gt.f32.partialorder %v691_v9, 0.0  ;;  %v597_v34 = vpop.permute.xlu2 %596 }
  0xe8   : > { %v775_v38 = vsel %vm765_vm13, %v1881_v47, 0.0  ;;  %v852_v57 = vpop.permute.xlu0 %851  ;;  %vm984_vm13 = vcmp.eq.s32.totalorder %v974_v26, %v1958_v27 }
  0xe9   : > { %v726_v33 = vsel %vm710_vm12, %v691_v9, %v718_v29  ;;  %v992_v29 = vstv %s1732_s24 }
  0xec   : > { %v693_v45 = vpop.f32.mrf.mxu1 }
  0xed   : > { %v694_v4 = vadd.f32 %v1874_v37, %v693_v45  ;;  %v795_v45 = vsel %vm785_vm4, %v792_v40, 0.0 }
  0xef   : > { %v719_v20 = vmul.f32 0.01, %v694_v4  ;;  %vm711_vm10 = vcmp.gt.f32.partialorder %v694_v4, 0.0 }
  0xf0   : > { %v1885_v51 = vpop.permute.xlu1 %802 }
  0xf1   : > { %v727_v30 = vsel %vm711_vm10, %v694_v4, %v719_v20  ;;  %vm805_vm5 = vcmp.eq.s32.totalorder %v1888_v54, %v1885_v51  ;;  %vm1010_vm10 = vcmask 130048  }
  0xf2   : > { %v815_v47 = vsel %vm805_vm5, %v812_v8, 0.0 }
  0xf4   : > { %v696_v48 = vpop.f32.mrf.mxu1 }
  0xf5   : > { %v697_v2 = vadd.f32 %v1874_v37, %v696_v48 }
  0xf7   : > { %v720_v13 = vmul.f32 0.01, %v697_v2  ;;  %vm712_vm9 = vcmp.gt.f32.partialorder %v697_v2, 0.0 }
  0xf9   : > { %v594_v56 = vpop.permute.xlu1 %593  ;;  %v728_v28 = vsel %vm712_vm9, %v697_v2, %v720_v13 }
  0xfa   : > { %vm598_vm2 = vcmp.eq.s32.totalorder %v1888_v54, %v594_v56  ;;  %v861_v56 = vld [vmem:[%s1775_s23] sm:$0xff] }
  0xfb   : > { %v1337_v62 = vsel %vm598_vm2, 1.0, %v1582_v61  ;;  %vm599_vm2 = vcmp.eq.s32.totalorder %v1888_v54, %v597_v34  ;;  %v978_v34 = vadd.s32 32, %v974_v26 }
  0xfc   : > { %v699_v53 = vpop.f32.mrf.mxu1  ;;  %1339 = vmatmul.msk.f32.vlgmr.msra.gmra.mxu0 %vm604_vm3, %v1337_v62  ;;  %v1338_v39 = vsel %vm599_vm2, 1.0, %v1582_v61 }
  0xfd   : > { %v700_v0 = vadd.f32 %v1874_v37, %v699_v53  ;;  %v863_v53 = vld [vmem:[%s1775_s23 + $0x10] sm:$0xff] }
  0xff   : > { %v721_v6 = vmul.f32 0.01, %v700_v0  ;;  %vm713_vm7 = vcmp.gt.f32.partialorder %v700_v0, 0.0 }
 0x101   : > { %v729_v15 = vsel %vm713_vm7, %v700_v0, %v721_v6  ;;  %v857_v59 = vpop.permute.xlu1 %856  ;;  %vm1962_vm7 = vcmp.lt.s32.totalorder %v1888_v54, %v992_v29  ;;  %v976_v54 = vadd.s32 16, %v974_v26 }
 0x102   : > { %vm994_vm15 = vmand %vm984_vm13, %vm1962_vm7 }
 0x103   : > { %vm986_vm11 = vcmp.eq.s32.totalorder %v976_v54, %v1958_v27 }
 0x104   : > { %v702_v1 = vpop.f32.mrf.mxu1  ;;  %1340 = vmatmul.msk.f32.gmra.mxu0 %vm604_vm3, %v1338_v39  ;;  %vm996_vm12 = vmand %vm986_vm11, %vm1962_vm7 }
 0x105   : > { %v703_v3 = vadd.f32 %v1874_v37, %v702_v1  ;;  %v755_v37 = vsel %vm743_vm14, %v1883_v49, 0.0  ;;  %v865_v49 = vld [vmem:[%s1724_s27] sm:$0xff]  ;;  %vm988_vm14 = vcmp.eq.s32.totalorder %v978_v34, %v1958_v27 }
 0x106   : > { %v777_v43 = vadd.f32 %v775_v38, %v755_v37  ;;  %890 = vmatpush.msrb.mxu3 %v865_v49  ;;  %vm998_vm1 = vmand %vm988_vm14, %vm1962_vm7  ;;  %v977_v49 = vadd.s32 24, %v974_v26 }
 0x107   : > { %vm714_vm6 = vcmp.gt.f32.partialorder %v703_v3, 0.0  ;;  %v722_v5 = vmul.f32 0.01, %v703_v3 }
 0x108   : > { %v797_v46 = vadd.f32 %v795_v45, %v777_v43  ;;  %916 = vmatpush.msra.mxu3 %v864_v50  ;;  %v1006_v43 = vsel %vm998_vm1, 1.0, %v1582_v61 }
 0x109   : > { %v730_v12 = vsel %vm714_vm6, %v703_v3, %v722_v5  ;;  %v1455_v3 = vld [vmem:[%s539_s10] ss:$0 sm:$0xff] }
 0x10a   : > { %833 = vmatpush.msra.mxu2 %v730_v12  ;;  %v817_v48 = vadd.f32 %v815_v47, %v797_v46  ;;  %917 = vmatpush.msra.mxu3 %v863_v53  ;;  %v1088_v46 = vsel %vm1010_vm10, %v1006_v43, 0.0 }
 0x10c   : > { %834 = vmatpush.msra.mxu2 %v729_v15  ;;  %918 = vmatpush.msra.mxu3 %v862_v55 }
 0x10e   : > { %835 = vmatpush.msra.mxu2 %v728_v28  ;;  %919 = vmatpush.msra.mxu3 %v861_v56  ;;  %v975_v28 = vadd.s32 8, %v974_v26  ;;  %v980_v56 = vadd.s32 48, %v974_v26 }
 0x110   : > { %836 = vmatpush.msra.mxu2 %v727_v30  ;;  %vm985_vm8 = vcmp.eq.s32.totalorder %v975_v28, %v1958_v27 }
 0x111   : > { %vm995_vm9 = vmand %vm985_vm8, %vm1962_vm7 }
 0x112   : > { %837 = vmatpush.msra.mxu2 %v726_v33  ;;  %v1970_v52 = vsel %vm995_vm9, 1.0, %v1582_v61  ;;  %v1981_v33 = vsel %vm996_vm12, 1.0, %v1582_v61 }
 0x113   : > { %v1079_v31 = vsel %vm1010_vm10, %v1970_v52, 0.0  ;;  %v1082_v35 = vsel %vm1010_vm10, %v1981_v33, 0.0 }
 0x114   : > { %838 = vmatpush.msra.mxu2 %v725_v41  ;;  %v979_v41 = vadd.s32 40, %v974_v26 }
 0x116   : > { %839 = vmatpush.msra.mxu2 %v724_v44  ;;  %vm989_vm2 = vcmp.eq.s32.totalorder %v979_v41, %v1958_v27 }
 0x117   : > { %1349 = vmatmul.msk.f32.vlgmr.msra.gmra.mxu2 %vm604_vm3, %v816_v42  ;;  %v1002_v42 = vsel %vm994_vm15, 1.0, %v1582_v61  ;;  %vm999_vm5 = vmand %vm989_vm2, %vm1962_vm7  ;;  %vm990_vm15 = vcmp.eq.s32.totalorder %v980_v56, %v1958_v27 }
 0x118   : > { %v1076_v45 = vsel %vm1010_vm10, %v1002_v42, 0.0 }
 0x119   : > { %1077 = vadd.xlane.f32.xlu0 %v1076_v45 }
 0x11f   : > { %1350 = vmatmul.msk.f32.gmra.mxu2 %vm604_vm3, %v817_v48 }
 0x179   : > { %v628_v63 = vpop.f32.mrf.mxu0 }
 0x181   : > { %v631_v0 = vpop.f32.mrf.mxu0 }
 0x19a   : > { %v841_v51 = vpop.f32.mrf.mxu2 }
 0x19b   : > { %v859_v58 = vmul.f32 %v852_v57, %v841_v51  ;;  %v981_v57 = vadd.s32 56, %v974_v26 }
 0x19d   : > { %1351 = vmatmul.msk.f32.vlgmr.msrb.gmra.mxu3 %vm642_vm0, %v859_v58  ;;  %vm991_vm12 = vcmp.eq.s32.totalorder %v981_v57, %v1958_v27 }
 0x19e   : > { %vm1001_vm14 = vmand %vm991_vm12, %vm1962_vm7 }
 0x1a2   : > { %v844_v60 = vpop.f32.mrf.mxu2 }
 0x1a3   : > { %v860_v62 = vmul.f32 %v857_v59, %v844_v60  ;;  %v1007_v60 = vsel %vm999_vm5, 1.0, %v1582_v61  ;;  %vm1000_vm5 = vmand %vm990_vm15, %vm1962_vm7 }
 0x1a5   : > { %1352 = vmatmul.msk.f32.gmra.mxu3 %vm642_vm0, %v860_v62  ;;  %v1091_v62 = vsel %vm1010_vm10, %v1007_v60, 0.0 }
 0x1a6   : > { %1092 = vadd.xlane.f32.xlu0 %v1091_v62 }
 0x1ad   : > { %1353 = vmatmul.msk.f32.vlgmr.msra.gmra.mxu3 %vm642_vm0, %v628_v63 }
 0x1b5   : > { %1354 = vmatmul.msk.f32.gmra.mxu3 %vm642_vm0, %v631_v0 }
 0x220   : > { %v892_v1 = vpop.f32.mrf.mxu3 }
 0x228   : > { %v895_v2 = vpop.f32.mrf.mxu3 }
 0x230   : > { %v921_v4 = vpop.f32.mrf.mxu3 }
 0x231   : > { %v922_v5 = vadd.f32 %v921_v4, %v892_v1 }
 0x233   : > { %v931_v6 = vadd.f32 %v1455_v3, %v922_v5 }
 0x235   : > { %v935_v7 = vmul.f32 0.01, %v931_v6  ;;  %vm933_vm3 = vcmp.gt.f32.partialorder %v931_v6, 0.0 }
 0x237   : > { %v1942_v8 = vsel %vm933_vm3, %v931_v6, %v935_v7  ;;  %vm987_vm3 = vcmp.eq.s32.totalorder %v977_v49, %v1958_v27 }
 0x238   : > { %v924_v9 = vpop.f32.mrf.mxu3  ;;  %v939_v10 = vmul.f32 %v1942_v8, %v1942_v8 }
 0x239   : > { %v925_v11 = vadd.f32 %v924_v9, %v895_v2  ;;  %v1009_v2 = vsel %vm1001_vm14, 1.0, %v1582_v61 }
 0x23a   : > { %v941_v12 = vsel %vm642_vm0, %v939_v10, 0.0  ;;  %v1008_v10 = vsel %vm1000_vm5, 1.0, %v1582_v61 }
 0x23b   : > { %v932_v13 = vadd.f32 %v1455_v3, %v925_v11  ;;  %942 = vadd.xlane.f32.xlu1 %v941_v12  ;;  %v1097_v3 = vsel %vm1010_vm10, %v1009_v2, 0.0  ;;  %v1094_v11 = vsel %vm1010_vm10, %v1008_v10, 0.0  ;;  %v1078_v12 = vpop.xlane.xlu0 %1077 }
 0x23d   : > { %v936_v14 = vmul.f32 0.01, %v932_v13  ;;  %vm934_vm6 = vcmp.gt.f32.partialorder %v932_v13, 0.0 }
 0x23f   : > { %v1947_v15 = vsel %vm934_vm6, %v932_v13, %v936_v14  ;;  %vm997_vm6 = vmand %vm987_vm3, %vm1962_vm7  ;;  %vm1100_vm7 = vcmp.gt.f32.partialorder %v1078_v12, 0.0 }
 0x240   : > { %v940_v20 = vmul.f32 %v1947_v15, %v1947_v15  ;;  %v1005_v51 = vsel %vm997_vm6, 1.0, %v1582_v61 }
 0x241   : > { %v1085_v63 = vsel %vm1010_vm10, %v1005_v51, 0.0 }
 0x242   : > { %v944_v23 = vsel %vm642_vm0, %v940_v20, 0.0 }
 0x243   : > { %945 = vadd.xlane.f32.xlu2 %v944_v23  ;;  %1086 = vadd.xlane.f32.xlu1 %v1085_v63  ;;  %v1093_v29 = vpop.xlane.xlu0 %1092 }
 0x24b   : > { %1080 = vadd.xlane.f32.xlu2 %v1079_v31  ;;  %1095 = vadd.xlane.f32.xlu1 %v1094_v11 }
 0x253   : > { %1083 = vadd.xlane.f32.xlu2 %v1082_v35 }
 0x25b   : > { %1089 = vadd.xlane.f32.xlu2 %v1088_v46 }
 0x263   : > { %1098 = vadd.xlane.f32.xlu2 %v1097_v3 }
 0x2ae   : > { %v1974_v32 = vpop.xlane.xlu1 %942 }
 0x2af   : > { %1457 = vrsqrt.f32 %v1974_v32  ;;  %vm955_vm8 = vweird.f32 %v1974_v32 }
 0x2b5   : > { %v1458_v36 = vpop.eup %1457 }
 0x2b6   : > { %v950_v37 = vmul.f32 %v1458_v36, %v1974_v32  ;;  %v946_v38 = vpop.xlane.xlu2 %945  ;;  %vm956_vm4 = vweird.f32 %v1458_v36  ;;  %v1087_v26 = vpop.xlane.xlu1 %1086 }
 0x2b7   : > { %1459 = vrsqrt.f32 %v946_v38  ;;  %vm2004_vm11 = vmor %vm955_vm8, %vm956_vm4  ;;  %vm965_vm13 = vweird.f32 %v946_v38  ;;  %vm948_vm2 = vcmp.eq.f32.partialorder %v946_v38, 0.0  ;;  %vm947_vm4 = vcmp.eq.f32.partialorder %v1974_v32, 0.0 }
 0x2b8   : > { %v951_v39 = vmul.f32 %v1458_v36, %v950_v37 }
 0x2ba   : > { %v952_v40 = vmul.f32 0.5, %v951_v39 }
 0x2bc   : > { %v953_v47 = vsub.f32 1.5, %v952_v40 }
 0x2bd   : > { %v1460_v44 = vpop.eup %1459 }
 0x2be   : > { %v960_v48 = vmul.f32 %v1460_v44, %v946_v38  ;;  %v954_v55 = vmul.f32 %v1458_v36, %v953_v47  ;;  %vm966_vm9 = vweird.f32 %v1460_v44  ;;  %v1081_v61 = vpop.xlane.xlu2 %1080  ;;  %v1096_v31 = vpop.xlane.xlu1 %1095 }
 0x2bf   : > { %vm967_vm1 = vmor %vm965_vm13, %vm966_vm9  ;;  %vm1101_vm6 = vcmp.gt.f32.partialorder %v1081_v61, 0.0  ;;  %vm1106_vm9 = vcmp.gt.f32.partialorder %v1096_v31, 0.0 }
 0x2c0   : > { %v961_v50 = vmul.f32 %v1460_v44, %v960_v48  ;;  %v958_v1 = vsel %vm2004_vm11, %v1458_v36, %v954_v55  ;;  %vm1103_vm11 = vcmp.gt.f32.partialorder %v1087_v26, 0.0 }
 0x2c1   : > { %v969_v6 = vsel %vm947_vm4, 1.0, %v958_v1 }
 0x2c2   : > { %v962_v53 = vmul.f32 0.5, %v961_v50  ;;  %v971_v9 = vmul.f32 %v969_v6, %v1942_v8 }
 0x2c4   : > { %v963_v58 = vsub.f32 1.5, %v962_v53 }
 0x2c6   : > { %v964_v0 = vmul.f32 %v1460_v44, %v963_v58  ;;  %v1084_v8 = vpop.xlane.xlu2 %1083 }
 0x2c7   : > { %vm1102_vm8 = vcmp.gt.f32.partialorder %v1084_v8, 0.0 }
 0x2c8   : > { %v968_v4 = vsel %vm967_vm1, %v1460_v44, %v964_v0 }
 0x2c9   : > { %v970_v5 = vsel %vm948_vm2, 1.0, %v968_v4 }
 0x2ca   : > { %v972_v7 = vmul.f32 %v970_v5, %v1947_v15 }
 0x2cc   : > { %1049 = vmatpush.msrb.mxu0 %v972_v7  ;;  %1380 = vmatpush.msrb.mxu2 %v972_v7 }
 0x2ce   : > { %1050 = vmatpush.msrb.mxu0 %v971_v9  ;;  %1381 = vmatpush.msrb.mxu2 %v971_v9  ;;  %v1090_v15 = vpop.xlane.xlu2 %1089 }
 0x2cf   : > { %1355 = vmatmul.msk.f32.vlgmr.msrb.gmra.mxu0 %vm1010_vm10, %v1002_v42  ;;  %1359 = vmatmul.msk.f32.vlgmr.msrb.gmra.mxu2 %vm1010_vm10, %v1006_v43  ;;  %vm1104_vm3 = vcmp.gt.f32.partialorder %v1090_v15, 0.0 }
 0x2d7   : > { %1356 = vmatmul.msk.f32.gmra.mxu0 %vm1010_vm10, %v1970_v52  ;;  %1360 = vmatmul.msk.f32.gmra.mxu2 %vm1010_vm10, %v1007_v60 }
 0x2df   : > { %1357 = vmatmul.msk.f32.gmra.mxu0 %vm1010_vm10, %v1981_v33  ;;  %1361 = vmatmul.msk.f32.gmra.mxu2 %vm1010_vm10, %v1008_v10 }
 0x2e7   : > { %1358 = vmatmul.msk.f32.gmra.mxu0 %vm1010_vm10, %v1005_v51  ;;  %1362 = vmatmul.msk.f32.gmra.mxu2 %vm1010_vm10, %v1009_v2  ;;  %vm1105_vm10 = vcmp.gt.f32.partialorder %v1093_v29, 0.0 }
 0x34c   : > { %v1052_v13 = vpop.f32.mrf.mxu0 }
 0x34d   : > { %v1124_v14 = vsel %vm1100_vm7, %v1052_v13, %v1813_v16 }
 0x34e   : > { %1132 = vst.msk [vmem:[#allocation2] sm:$0xff] %vm642_vm0, %v1124_v14 }
 0x352   : > { %v1064_v20 = vpop.f32.mrf.mxu2 }
 0x353   : > { %v1128_v23 = vsel %vm1104_vm3, %v1064_v20, %v1833_v22 }
 0x354   : > { %v1055_v27 = vpop.f32.mrf.mxu0  ;;  %1136 = vst.msk [vmem:[#allocation2 + $0x20] sm:$0xff] %vm642_vm0, %v1128_v23 }
 0x355   : > { %v1125_v28 = vsel %vm1101_vm6, %v1055_v27, %v1823_v18 }
 0x356   : > { %1133 = vst.msk [vmem:[#allocation2 + $0x8] sm:$0xff] %vm642_vm0, %v1125_v28 }
 0x35a   : > { %v1067_v30 = vpop.f32.mrf.mxu2 }
 0x35b   : > { %v1129_v16 = vsel %vm1105_vm10, %v1067_v30, %v1830_v21  ;;  %v1099_v21 = vpop.xlane.xlu2 %1098 }
 0x35c   : > { %v1058_v52 = vpop.f32.mrf.mxu0  ;;  %1137 = vst.msk [vmem:[#allocation2 + $0x28] sm:$0xff] %vm642_vm0, %v1129_v16  ;;  %vm1107_vm12 = vcmp.gt.f32.partialorder %v1099_v21, 0.0 }
 0x35d   : > { %v1126_v22 = vsel %vm1102_vm8, %v1058_v52, %v1835_v24 }
 0x35e   : > { %1134 = vst.msk [vmem:[#allocation2 + $0x10] sm:$0xff] %vm642_vm0, %v1126_v22 }
 0x362   : > { %v1070_v32 = vpop.f32.mrf.mxu2 }
 0x363   : > { %v1130_v18 = vsel %vm1106_vm9, %v1070_v32, %v1827_v19 }
 0x364   : > { %v1061_v54 = vpop.f32.mrf.mxu0  ;;  %1138 = vst.msk [vmem:[#allocation2 + $0x30] sm:$0xff] %vm642_vm0, %v1130_v18 }
 0x365   : > { %v1127_v34 = vsel %vm1103_vm11, %v1061_v54, %v1838_v25 }
 0x366   : > { %1135 = vst.msk [vmem:[#allocation2 + $0x18] sm:$0xff] %vm642_vm0, %v1127_v34 }
 0x368   : > { %1143 = sbr.rel (%p1363_p8) target bundleno = 879 (0x36f), region = 91 }
 0x36a   : > { %v1073_v33 = vpop.f32.mrf.mxu2 }
 0x36b   : > { %v1131_v24 = vsel %vm1107_vm12, %v1073_v33, %v1817_v17 }
 0x36c   : > { %1139 = vst.msk [vmem:[#allocation2 + $0x38] sm:$0xff] %vm642_vm0, %v1131_v24 }
 0x36d   : > { %1144 = vst.msk [vmem:[#allocation9] sm:$0xff] %vm642_vm0, %v971_v9 }
 0x36e   : > { %1145 = vst.msk [vmem:[#allocation9 + $0x8] sm:$0xff] %vm642_vm0, %v972_v7 }
 0x36f PF: > { %p1393_p9 = scmp.eq.s32.totalorder %s1673_s0, 1  ;;  %s1583_s24 = smov [#allocation9]  }
 0x370   : > { %s1151_s28 = sshll.u32 %s1583_s24, 4  ;;  %s1153_s16 = sshll.u32 %s2084_s12, 4  ;;  %s1152_s28 = int_to_ptr.vmem [resolvable:$true] %s1151_s28  ;;  %s1154_s16 = int_to_ptr.hbm [resolvable:$true] %s1153_s16 }
 0x371   : > { %s1584_s4 = smov 128   ;;  %s1585_s13 = smov 8  }
 0x372   : > { %1385 = dma.vmem_to_hbm [thread:$0]  (%p1393_p9), %s1152_s28, 256, %s1154_s16, [#allocation8], %s1584_s4, %s1584_s4, %s1585_s13  }
 0x373   : > { %1556 = dma.done.wait (%p1393_p9), [#allocation8], 256  }
 0x374   : > { %1558 = vsyncadd (%p1393_p9), [#allocation8], 4294967040 }
 0x375 PF: > { %s2109_s28 = sld [smem:[#allocation17_spill]] }
 0x376   : > { %s2110_s25 = sld [smem:[#allocation15_spill]] }
 0x377   : > { %s2111_s26 = sld [smem:[#allocation16_spill]] }
 0x378   : > { %s2112_s27 = sld [smem:[#allocation18_spill]] }
 0x37b   : > { %p31_p10 = scmp.ge.s32.totalorder %s2109_s28, 4  }
 0x37d   :  { %33 = sbr.rel (!%p31_p10) target bundleno = 13 (0xd), region = 155 }
 0x382   :  { %1170 = vsyncpa [#allocation7], 1 }
 0x383   :  { %1172 = vsyncpa [#allocation7 + $0x1], 1 }
 0x384   :  { %1173 = vsyncpa [#allocation8], 1 }
 0x385   :  { %1175 = vsyncpa [#allocation8 + $0x1], 1 }
 0x386   :  { %1176 = vsyncmov [#allocation3] }
 0x389   :  { %s1177_s0 = vpop.sfrf %1176 }
 0x38a   :  { %p1368_p11 = scmp.ne.s32.totalorder %s1177_s0, 0 }
 0x38c   :  { %1181 = shalt.err (%p1368_p11)  }

</bundles_post_ra>
